<compile_context>
chip_gen: v7x
topology: tpu7x:2x2x1
jax: 0.10.0
libtpu: 0.0.40
codegen_flags: <defaults>
</compile_context>

<pallas_src>
import jax
import jax.numpy as jnp
from jax.experimental import pallas as pl
from jax.experimental.pallas import tpu as pltpu


def mlp_kernel(xt_ref, w1_ref, b1_ref, w2_ref, b2_ref, ot_ref):
    # xt_ref: (F, tb)  -- batch on the lane axis
    # w1_ref: (H, F), b1_ref: (H, 1), w2_ref: (C, H), b2_ref: (C, 1)
    # ot_ref: (C, tb)  -- lane-dense output tile
    x = xt_ref[...]
    h = jnp.dot(w1_ref[...], x, preferred_element_type=jnp.float32,
                precision=jax.lax.Precision.HIGHEST)               # (H, tb)
    h = jnp.maximum(h + b1_ref[...], 0.0)                          # ReLU
    logits = jnp.dot(w2_ref[...], h, preferred_element_type=jnp.float32,
                     precision=jax.lax.Precision.HIGHEST)          # (C, tb)
    logits = logits + b2_ref[...]
    # Numerically stable softmax over the class axis (axis 0 in this layout).
    m = jnp.max(logits, axis=0, keepdims=True)
    e = jnp.exp(logits - m)
    denom = jnp.sum(e, axis=0, keepdims=True)
    # Exact divide: approx EUP reciprocal (~2.4e-4 rel err) breaks the 1e-4
    # tolerance, and nothing else saturates here so the EUP-slot saving is moot.
    ot_ref[...] = (e / denom).astype(ot_ref.dtype)


def prepare_params(w1, b1, w2, b2):
    """One-time layout prep (hoisted out of the forward path).

    PyTorch layout: w1 (H, F), b1 (H,), w2 (C, H), b2 (C,).
    Kernel layout:  same weight orientation (batch sits on lanes instead);
                    biases reshaped to column vectors (H, 1) / (C, 1).
    """
    w1 = jnp.asarray(w1, jnp.float32)
    w2 = jnp.asarray(w2, jnp.float32)
    b1c = jnp.asarray(b1, jnp.float32).reshape(-1, 1)
    b2c = jnp.asarray(b2, jnp.float32).reshape(-1, 1)
    return w1, b1c, w2, b2c


def _pick_batch_tile(B, F, H, C):
    """Batch tile (lanes per grid step). All Python-static shape math."""
    if B <= 1024:
        return B  # single step; block == full array, no 128-multiple constraint
    # Byte budget: ~2 MiB of x per tile (covers double-buffered x/out + h temp).
    per_col_bytes = 4 * (2 * F + H + 2 * C)
    tb_budget = max(128, ((2 * 1024 * 1024) // per_col_bytes) // 128 * 128)
    # Keep grid >= 2 so ("parallel",) can shard tiles across v7x's two TCs.
    tb_half = ((-(-B // 2)) + 127) // 128 * 128
    return max(128, min(tb_budget, tb_half))


@jax.jit
def model_v0_forward(x, w1, b1c, w2, b2c):
    """x: (B, F) float32; params pre-laid-out by prepare_params(). Returns (B, C)."""
    B, F = x.shape
    H = w1.shape[0]
    C = w2.shape[0]

    x_t = x.T                      # (F, B): batch -> lane axis (layout plumbing)
    tb = _pick_batch_tile(B, F, H, C)
    grid = (pl.cdiv(B, tb),)

    # Per-step VMEM footprint (f32, incl. double-buffered streamed tiles).
    tile_bytes = 4 * (2 * F * tb + 2 * C * tb + H * tb + H * F + H + C * H + C)
    vmem_limit = int(min(48 << 20, max(16 << 20, 4 * tile_bytes)))

    cost = pl.CostEstimate(
        flops=2 * B * (F * H + H * C),
        transcendentals=B * C,  # exp in the softmax
        bytes_accessed=4 * (B * F + F * H + H + H * C + C + B * C),
    )

    out_t = pl.pallas_call(
        mlp_kernel,
        out_shape=jax.ShapeDtypeStruct((C, B), jnp.float32),
        grid=grid,
        in_specs=[
            pl.BlockSpec((F, tb), lambda i: (0, i)),   # x^T: streamed over batch lanes
            pl.BlockSpec((H, F), lambda i: (0, 0)),    # W1: VMEM-resident
            pl.BlockSpec((H, 1), lambda i: (0, 0)),    # b1
            pl.BlockSpec((C, H), lambda i: (0, 0)),    # W2
            pl.BlockSpec((C, 1), lambda i: (0, 0)),    # b2
        ],
        out_specs=pl.BlockSpec((C, tb), lambda i: (0, i)),  # lane-dense output tile
        compiler_params=pltpu.CompilerParams(
            dimension_semantics=("parallel",),  # shards batch tiles across TCs on v7x
            vmem_limit_bytes=vmem_limit,
        ),
        cost_estimate=cost,
    )(x_t, w1, b1c, w2, b2c)

    # NOTE: when B % tb != 0 the padded lanes of the last tile go through
    # exp()/divide on stale buffer contents; those lanes are masked on writeback,
    # so any inf/NaN there is discarded (harmless).
    return out_t.T                 # (B, C), matching the PyTorch module


def init_linear_params(key, out_features, in_features):
    """Deterministic init mimicking nn.Linear: U(-1/sqrt(fan_in), 1/sqrt(fan_in))."""
    kw, kb = jax.random.split(key)
    bound = 1.0 / jnp.sqrt(jnp.float32(in_features))
    w = jax.random.uniform(kw, (out_features, in_features), jnp.float32, -bound, bound)
    b = jax.random.uniform(kb, (out_features,), jnp.float32, -bound, bound)
    return w, b


if __name__ == "__main__":
    n_features = 16
    neurons_hidden = 32
    n_class_pred = 4
    batch = 8

    key = jax.random.PRNGKey(0)
    k_x, k_l1, k_l2 = jax.random.split(key, 3)

    x = jax.random.normal(k_x, (batch, n_features), jnp.float32)
    w1, b1 = init_linear_params(k_l1, neurons_hidden, n_features)
    w2, b2 = init_linear_params(k_l2, n_class_pred, neurons_hidden)

    # One-time layout prep (hoisted out of the forward pass).
    params = prepare_params(w1, b1, w2, b2)

    out = model_v0_forward(x, *params)
    out = jax.block_until_ready(out)

    # Pure-JAX reference (same HIGHEST matmul precision as the kernel).
    h_ref = jnp.maximum(
        jnp.dot(x, w1.T, precision=jax.lax.Precision.HIGHEST) + b1, 0.0)
    logits_ref = jnp.dot(h_ref, w2.T, precision=jax.lax.Precision.HIGHEST) + b2
    ref = jax.nn.softmax(logits_ref, axis=1)

    assert out.shape == (batch, n_class_pred)
    max_diff = float(jnp.max(jnp.abs(out - ref)))
    assert jnp.allclose(out, ref, atol=1e-4, rtol=1e-4), f"max abs diff {max_diff}"
    assert jnp.allclose(jnp.sum(out, axis=1), 1.0, atol=1e-4)

    print("KERNEL_OK")
</pallas_src>

<mosaic_0001>
module attributes {stable_mosaic.version = 11 : i64} {
  func.func @mlp_kernel(%arg0: i32, %arg1: memref<16x8xf32, #tpu.memory_space<vmem>>, %arg2: memref<32x16xf32, #tpu.memory_space<vmem>>, %arg3: memref<32x1xf32, #tpu.memory_space<vmem>>, %arg4: memref<4x32xf32, #tpu.memory_space<vmem>>, %arg5: memref<4x1xf32, #tpu.memory_space<vmem>>, %arg6: memref<4x8xf32, #tpu.memory_space<vmem>>) attributes {dimension_semantics = [#tpu.dimension_semantics<parallel>], iteration_bounds = array<i64: 1>, scalar_prefetch = 0 : i64, scratch_operands = 0 : i64, tpu.core_type = #tpu.core_type<tc>, window_params = [{transform_indices = @transform_0, window_bounds = array<i64: 16, 8>}, {pipeline_mode = #tpu.pipeline_mode<synchronous>, transform_indices = @transform_1, window_bounds = array<i64: 32, 16>}, {pipeline_mode = #tpu.pipeline_mode<synchronous>, transform_indices = @transform_2, window_bounds = array<i64: 32, 1>}, {pipeline_mode = #tpu.pipeline_mode<synchronous>, transform_indices = @transform_3, window_bounds = array<i64: 4, 32>}, {pipeline_mode = #tpu.pipeline_mode<synchronous>, transform_indices = @transform_4, window_bounds = array<i64: 4, 1>}, {transform_indices = @transform_5, window_bounds = array<i64: 4, 8>}]} {
    %c0 = arith.constant 0 : index
    %c0_0 = arith.constant 0 : index
    %0 = vector.load %arg1[%c0, %c0_0] : memref<16x8xf32, #tpu.memory_space<vmem>>, vector<16x8xf32>
    %c0_1 = arith.constant 0 : index
    %c0_2 = arith.constant 0 : index
    %1 = vector.load %arg2[%c0_1, %c0_2] : memref<32x16xf32, #tpu.memory_space<vmem>>, vector<32x16xf32>
    %cst = arith.constant dense<0.000000e+00> : vector<32x8xf32>
    %2 = tpu.matmul %1, %0, %cst {dimension_numbers = #tpu.dot_dimension_numbers<[1], [0], [0], [1], [0, 0, 1, 1], [], []>, precision = #tpu.contract_precision<fp32>} : vector<32x16xf32>, vector<16x8xf32>, vector<32x8xf32> -> vector<32x8xf32>
    %c0_3 = arith.constant 0 : index
    %c0_4 = arith.constant 0 : index
    %3 = vector.load %arg3[%c0_3, %c0_4] : memref<32x1xf32, #tpu.memory_space<vmem>>, vector<32x1xf32>
    %4 = vector.broadcast %3 : vector<32x1xf32> to vector<32x8xf32>
    %5 = arith.addf %2, %4 : vector<32x8xf32>
    %cst_5 = arith.constant 0.000000e+00 : f32
    %6 = vector.broadcast %cst_5 : f32 to vector<32x8xf32>
    %7 = arith.maximumf %5, %6 : vector<32x8xf32>
    %c0_6 = arith.constant 0 : index
    %c0_7 = arith.constant 0 : index
    %8 = vector.load %arg4[%c0_6, %c0_7] : memref<4x32xf32, #tpu.memory_space<vmem>>, vector<4x32xf32>
    %cst_8 = arith.constant dense<0.000000e+00> : vector<4x8xf32>
    %9 = tpu.matmul %8, %7, %cst_8 {dimension_numbers = #tpu.dot_dimension_numbers<[1], [0], [0], [1], [0, 0, 1, 1], [], []>, precision = #tpu.contract_precision<fp32>} : vector<4x32xf32>, vector<32x8xf32>, vector<4x8xf32> -> vector<4x8xf32>
    %c0_9 = arith.constant 0 : index
    %c0_10 = arith.constant 0 : index
    %10 = vector.load %arg5[%c0_9, %c0_10] : memref<4x1xf32, #tpu.memory_space<vmem>>, vector<4x1xf32>
    %11 = vector.broadcast %10 : vector<4x1xf32> to vector<4x8xf32>
    %12 = arith.addf %9, %11 : vector<4x8xf32>
    %cst_11 = arith.constant dense<0xFF800000> : vector<8xf32>
    %13 = vector.multi_reduction <maximumf>, %12, %cst_11 [0] : vector<4x8xf32> to vector<8xf32>
    %14 = vector.shape_cast %13 : vector<8xf32> to vector<1x8xf32>
    %15 = vector.broadcast %14 : vector<1x8xf32> to vector<4x8xf32>
    %16 = arith.subf %12, %15 : vector<4x8xf32>
    %17 = math.exp %16 : vector<4x8xf32>
    %cst_12 = arith.constant dense<0.000000e+00> : vector<8xf32>
    %18 = vector.multi_reduction <add>, %17, %cst_12 [0] : vector<4x8xf32> to vector<8xf32>
    %19 = vector.shape_cast %18 : vector<8xf32> to vector<1x8xf32>
    %20 = vector.broadcast %19 : vector<1x8xf32> to vector<4x8xf32>
    %21 = arith.divf %17, %20 : vector<4x8xf32>
    %c0_13 = arith.constant 0 : index
    %c0_14 = arith.constant 0 : index
    %22 = vector.load %arg6[%c0_13, %c0_14] : memref<4x8xf32, #tpu.memory_space<vmem>>, vector<4x8xf32>
    tpu.vector_store %arg6[%c0_13, %c0_14], %21 {strides = array<i32>} : memref<4x8xf32, #tpu.memory_space<vmem>>, vector<4x8xf32>,
    return
  }
  func.func @transform_0(%arg0: i32) -> (i32, i32) {
    %c0_i32 = arith.constant 0 : i32
    %c0_i32_0 = arith.constant 0 : i32
    return %c0_i32, %arg0 : i32, i32
  }
  func.func @transform_1(%arg0: i32) -> (i32, i32) {
    %c0_i32 = arith.constant 0 : i32
    %c0_i32_0 = arith.constant 0 : i32
    %c0_i32_1 = arith.constant 0 : i32
    return %c0_i32, %c0_i32_0 : i32, i32
  }
  func.func @transform_2(%arg0: i32) -> (i32, i32) {
    %c0_i32 = arith.constant 0 : i32
    %c0_i32_0 = arith.constant 0 : i32
    %c0_i32_1 = arith.constant 0 : i32
    return %c0_i32, %c0_i32_0 : i32, i32
  }
  func.func @transform_3(%arg0: i32) -> (i32, i32) {
    %c0_i32 = arith.constant 0 : i32
    %c0_i32_0 = arith.constant 0 : i32
    %c0_i32_1 = arith.constant 0 : i32
    return %c0_i32, %c0_i32_0 : i32, i32
  }
  func.func @transform_4(%arg0: i32) -> (i32, i32) {
    %c0_i32 = arith.constant 0 : i32
    %c0_i32_0 = arith.constant 0 : i32
    %c0_i32_1 = arith.constant 0 : i32
    return %c0_i32, %c0_i32_0 : i32, i32
  }
  func.func @transform_5(%arg0: i32) -> (i32, i32) {
    %c0_i32 = arith.constant 0 : i32
    %c0_i32_0 = arith.constant 0 : i32
    return %c0_i32, %arg0 : i32, i32
  }
}

</mosaic_0001>

<bundles_post_ra>
// kernel: model_v0_forward.1
= control target key start
LH: loop header
LB: loop body
LE: loop exit
PB: predicated region body
PF: predicated region fallthrough
CT: control target
= control target key end

     0   :  { %vm51_vm0 = vcmask 130048   ;;  %v1509_v9 = vmov 0   ;;  %s1662_s0 = inlined_call_operand.vmem [shape: f32[16,8], index: 0, kind: input, shape index: {}]   ;;  %s1663_s1 = inlined_call_operand.vmem [shape: f32[32,16], index: 1, kind: input, shape index: {}]   ;;  %s1664_s2 = inlined_call_operand.vmem [shape: f32[32,1], index: 2, kind: input, shape index: {}]   ;;  %s1665_s3 = inlined_call_operand.vmem [shape: f32[4,32], index: 3, kind: input, shape index: {}]   ;;  %s1666_s4 = inlined_call_operand.vmem [shape: f32[4,1], index: 4, kind: input, shape index: {}]   ;;  %s1667_s5 = inlined_call_operand.hbm [shape: f32[4,8], index: 5, kind: output, shape index: {}]  }
   0x1   :  { %v21_v0 = vld [vmem:[%s1662_s0] sm:$0xff]  ;;  %v22_v1 = vld [vmem:[%s1662_s0 + $0x8] sm:$0xff]  ;;  %v25_v7 = vld [vmem:[%s1663_s1 + $0x10] sm:$0xff]  ;;  %1479 = vset.pattern.permute.xlu0 %v1509_v9  ;;  %1480 = vset.pattern.permute.xlu1 %v1509_v9 }
   0x2   :  { %v23_v2 = vld [vmem:[%s1663_s1] sm:$0xff]  ;;  %v65_v3 = vand.u32 4294901760, %v21_v0  ;;  %v68_v4 = vand.u32 4294901760, %v22_v1  ;;  %v24_v6 = vld [vmem:[%s1663_s1 + $0x8] sm:$0xff]  ;;  %v26_v8 = vld [vmem:[%s1663_s1 + $0x18] sm:$0xff]  ;;  %v59_v12 = vsel %vm51_vm0, %v25_v7, 0 }
   0x3   :  { %v53_v5 = vsel %vm51_vm0, %v23_v2, 0  ;;  %v56_v11 = vsel %vm51_vm0, %v24_v6, 0  ;;  %v62_v13 = vsel %vm51_vm0, %v26_v8, 0  ;;  %v27_v14 = vld [vmem:[%s1664_s2] sm:$0xff]  ;;  %v29_v19 = vld [vmem:[%s1664_s2 + $0x10] sm:$0xff]  ;;  %v1575_v21 = vand.u32 4294901760, %v59_v12 }
   0x4   :  { %v1562_v10 = vand.u32 4294901760, %v53_v5  ;;  %v1567_v15 = vpack.c.bf16 %v68_v4, %v65_v3  ;;  %v1569_v16 = vand.u32 4294901760, %v56_v11  ;;  %v173_v17 = vsub.f32 %v21_v0, %v65_v3  ;;  %33 = vperm.xlu0 %1479, %v27_v14   ;;  %v28_v23 = vld [vmem:[%s1664_s2 + $0x8] sm:$0xff]  ;;  %43 = vperm.xlu1 %1480, %v29_v19  }
   0x5   :  { %v180_v18 = vsub.f32 %v22_v1, %v68_v4  ;;  %v1577_v22 = vand.u32 4294901760, %v62_v13 }
   0x6   :  { %v132_v20 = vsub.f32 %v53_v5, %v1562_v10 }
   0x7   :  { %10 = vsyncpa [#allocation3], 0  ;;  %1380 = vmatprep.subr.bf16.mxu0 %v1567_v15  ;;  %v142_v24 = vsub.f32 %v56_v11, %v1569_v16  ;;  %v174_v25 = vand.u32 4294901760, %v173_v17  ;;  %v181_v26 = vand.u32 4294901760, %v180_v18  ;;  %v30_v27 = vld [vmem:[%s1664_s2 + $0x18] sm:$0xff]  ;;  %v152_v29 = vsub.f32 %v59_v12, %v1575_v21 }
   0x8   :  { %1382 = vmatpush3.bf16.msra.mxu0 %v1567_v15  ;;  %v133_v28 = vand.u32 4294901760, %v132_v20  ;;  %v162_v30 = vsub.f32 %v62_v13, %v1577_v22  ;;  %38 = vperm.xlu0 %1479, %v28_v23   ;;  %v657_v37 = vld [vmem:[%s1666_s4] sm:$0xf]  ;;  %v1387_v46 = vpack.c.bf16 %v180_v18, %v173_v17  ;;  %v1510_v50 = vmov 0.0|0.0  }
   0x9   :  { %v143_v31 = vand.u32 4294901760, %v142_v24  ;;  %v175_v32 = vsub.f32 %v173_v17, %v174_v25  ;;  %v182_v33 = vsub.f32 %v180_v18, %v181_v26  ;;  %v153_v35 = vand.u32 4294901760, %v152_v29  ;;  %48 = vperm.xlu1 %1480, %v30_v27   ;;  %1403 = vmatprep.subr.bf16.mxu1 %v1510_v50  ;;  %v656_v52 = vld [vmem:[%s1665_s3] sm:$0xf]  ;;  %s1513_s3 = smov [#allocation2]  }
   0xa   :  { %v134_v34 = vsub.f32 %v132_v20, %v133_v28  ;;  %v163_v36 = vand.u32 4294901760, %v162_v30  ;;  %v1395_v49 = vpack.c.bf16 %v181_v26, %v174_v25  ;;  %vm1511_vm1 = vmmov 0   ;;  %s1179_s13 = sshll.u32 %s1513_s3, 4  ;;  %s1180_s13 = int_to_ptr.vmem [resolvable:$true] %s1179_s13 }
   0xb   :  { %v144_v38 = vsub.f32 %v142_v24, %v143_v31  ;;  %v176_v39 = vand.u32 4294901760, %v175_v32  ;;  %v183_v40 = vand.u32 4294901760, %v182_v33  ;;  %v154_v42 = vsub.f32 %v152_v29, %v153_v35  ;;  %s1485_s14 = scalar_lea.vmem %s1180_s13, 64  ;;  %p1490_p1 = scmp.lt.s32.totalorder %s1180_s13, %s1180_s13 }
   0xc   :  { %v135_v41 = vand.u32 4294901760, %v134_v34  ;;  %v164_v43 = vsub.f32 %v162_v30, %v163_v36  ;;  %660 = vperm.xlu0 %1479, %v657_v37   ;;  %v1512_v51 = vmov 0.0   ;;  %vm663_vm2 = vcmask 261120   ;;  %p1486_p0 = scmp.ne.s32.totalorder %s1180_s13, %s1485_s14  ;;  %p1491_p2 = scmp.lt.s32.totalorder %s1485_s14, %s1485_s14 }
   0xd   :  { %v145_v44 = vand.u32 4294901760, %v144_v38  ;;  %v1383_v45 = vpack.c.bf16 %v183_v40, %v176_v39  ;;  %v155_v47 = vand.u32 4294901760, %v154_v42  ;;  %1321 = vmatprep.mubr.msk.f32.mxu1 %vm1511_vm1, %v1512_v51  ;;  %v665_v54 = vsel %vm663_vm2, %v656_v52, 0 }
   0xe   :  { %1257 = vmatprep.mubr.f32.mxu0 %v135_v41  ;;  %v165_v48 = vand.u32 4294901760, %v164_v43  ;;  %v1615_v55 = vand.u32 4294901760, %v665_v54  ;;  %vm1152_vm3 = vcmask 60416   ;;  %p1492_p3 = por %p1491_p2, %p1490_p1 }
   0xf   :  { %1258 = vmatmul.mubr.f32.vlgmr.msra.gmra.mrb[0].mxu0 %v145_v44  ;;  %1384 = vmatprep.subr.bf16.mxu0 %v1383_v45 }
  0x10   :  { %1386 = vmatpush3.bf16.msra.mxu0 %v1383_v45  ;;  %1260 = vmatprep.mubr.f32.mxu0 %v155_v47  ;;  %v1618_v61 = vsub.f32 %v665_v54, %v1615_v55  ;;  %p1493_p4 = pnand %p1492_p3, %p1486_p0 }
  0x11   :  { %1388 = vmatprep.subr.bf16.mxu0 %v1387_v46 }
  0x12   :  { %v738_v6 = vand.u32 4294901760, %v1618_v61 }
  0x13   :  { %1261 = vmatmul.mubr.f32.gmra.mrb[2].mxu0 %v165_v48 }
  0x14   :  { %1267 = vmatprep.mubr.f32.mxu0 %v1562_v10 }
  0x17   :  { %1268 = vmatmul.mubr.f32.vlgmr.msra.gmra.mrb[0].mxu0 %v1569_v16 }
  0x18   :  { %1390 = vmatpush3.bf16.msra.mxu0 %v1387_v46  ;;  %1270 = vmatprep.mubr.f32.mxu0 %v1575_v21 }
  0x19   :  { %1392 = vmatprep.subr.bf16.mxu0 %v1567_v15 }
  0x1b   :  { %1271 = vmatmul.mubr.f32.gmra.mrb[2].mxu0 %v1577_v22 }
  0x1c   :  { %1277 = vmatprep.mubr.f32.mxu0 %v132_v20 }
  0x1f   :  { %1278 = vmatmul.mubr.f32.vlgmr.msra.gmra.mrb[0].mxu0 %v142_v24 }
  0x20   :  { %1394 = vmatpush3.bf16.msra.mxu0 %v1567_v15  ;;  %1280 = vmatprep.mubr.f32.mxu0 %v152_v29 }
  0x21   :  { %1396 = vmatprep.subr.bf16.mxu0 %v1395_v49 }
  0x23   :  { %1281 = vmatmul.mubr.f32.gmra.mrb[2].mxu0 %v162_v30 }
  0x24   :  { %1287 = vmatprep.mubr.f32.mxu0 %v133_v28 }
  0x27   :  { %1288 = vmatmul.mubr.f32.vlgmr.msra.gmra.mrb[0].mxu0 %v143_v31 }
  0x28   :  { %1398 = vmatpush3.bf16.msra.mxu0 %v1395_v49  ;;  %1290 = vmatprep.mubr.f32.mxu0 %v153_v35 }
  0x29   :  { %1400 = vmatprep.subr.bf16.mxu0 %v1567_v15 }
  0x2b   :  { %1291 = vmatmul.mubr.f32.gmra.mrb[2].mxu0 %v163_v36 }
  0x2c   :  { %1297 = vmatprep.mubr.f32.mxu0 %v1562_v10 }
  0x2f   :  { %1298 = vmatmul.mubr.f32.vlgmr.msra.gmra.mrb[0].mxu0 %v1569_v16 }
  0x30   :  { %1402 = vmatpush3.bf16.msra.mxu0 %v1567_v15  ;;  %1300 = vmatprep.mubr.f32.mxu0 %v1575_v21 }
  0x33   :  { %1301 = vmatmul.mubr.f32.gmra.mrb[2].mxu0 %v1577_v22 }
  0x34   :  { %1307 = vmatprep.mubr.f32.mxu0 %v1562_v10 }
  0x37   :  { %1308 = vmatmul.mubr.f32.vlgmr.msra.gmra.mrb[0].mxu0 %v1569_v16  ;;  %v739_v16 = vsub.f32 %v1618_v61, %v738_v6 }
  0x38   :  { %1310 = vmatprep.mubr.f32.mxu0 %v1575_v21 }
  0x39   :  { %v740_v28 = vand.u32 4294901760, %v739_v16 }
  0x3b   :  { %1311 = vmatmul.mubr.f32.gmra.mrb[2].mxu0 %v1577_v22 }
  0x83   :  { %v34_v53 = vpop.permute.xlu0 %33  ;;  %v44_v56 = vpop.permute.xlu1 %43 }
  0x87   :  { %v39_v57 = vpop.permute.xlu0 %38 }
  0x88   :  { %v49_v0 = vpop.permute.xlu1 %48 }
  0x8b   :  { %v661_v39 = vpop.permute.xlu0 %660 }
 0x10a   :  { %v1309_v58 = vpop.f32.mrb[0].mxu0 }
 0x10b   :  { %v1439_v59 = vadd.f32 %v1309_v58, %v39_v57  ;;  %v630_v60 = vpop.f32.mrb[1].mxu0 }
 0x10c   :  { %v1440_v62 = vadd.f32 %v630_v60, %v34_v53 }
 0x10d   :  { %v653_v63 = vmax.f32 %v1439_v59, 0.0 }
 0x10e   :  { %v652_v1 = vmax.f32 %v1440_v62, 0.0  ;;  %v1312_v2 = vpop.f32.mrb[2].mxu0 }
 0x10f   :  { %v671_v3 = vand.u32 4294901760, %v653_v63  ;;  %v1441_v4 = vadd.f32 %v1312_v2, %v49_v0  ;;  %v642_v5 = vpop.f32.mrb[3].mxu0 }
 0x110   :  { %v668_v7 = vand.u32 4294901760, %v652_v1  ;;  %v1442_v8 = vadd.f32 %v642_v5, %v44_v56 }
 0x111   :  { %v755_v9 = vsub.f32 %v653_v63, %v671_v3  ;;  %v655_v10 = vmax.f32 %v1441_v4, 0.0 }
 0x112   :  { %v748_v11 = vsub.f32 %v652_v1, %v668_v7  ;;  %v654_v12 = vmax.f32 %v1442_v8, 0.0  ;;  %v1404_v13 = vpack.c.bf16 %v671_v3, %v668_v7 }
 0x113   :  { %v756_v14 = vand.u32 4294901760, %v755_v9  ;;  %v677_v15 = vand.u32 4294901760, %v655_v10 }
 0x114   :  { %v749_v17 = vand.u32 4294901760, %v748_v11  ;;  %v674_v18 = vand.u32 4294901760, %v654_v12  ;;  %1405 = vmatpush3.bf16.msra.mxu1 %v1404_v13  ;;  %v1416_v19 = vpack.c.bf16 %v755_v9, %v748_v11 }
 0x115   :  { %v757_v20 = vsub.f32 %v755_v9, %v756_v14  ;;  %v769_v21 = vsub.f32 %v655_v10, %v677_v15  ;;  %1406 = vmatprep.subr.bf16.mxu1 %v1510_v50 }
 0x116   :  { %v750_v22 = vsub.f32 %v748_v11, %v749_v17  ;;  %v762_v23 = vsub.f32 %v654_v12, %v674_v18  ;;  %v1407_v24 = vpack.c.bf16 %v677_v15, %v674_v18  ;;  %v1428_v25 = vpack.c.bf16 %v756_v14, %v749_v17 }
 0x117   :  { %v758_v26 = vand.u32 4294901760, %v757_v20  ;;  %v770_v27 = vand.u32 4294901760, %v769_v21 }
 0x118   :  { %v751_v29 = vand.u32 4294901760, %v750_v22  ;;  %v763_v30 = vand.u32 4294901760, %v762_v23  ;;  %1408 = vmatpush3.bf16.msra.mxu1 %v1407_v24  ;;  %v1419_v31 = vpack.c.bf16 %v769_v21, %v762_v23 }
 0x119   :  { %v771_v32 = vsub.f32 %v769_v21, %v770_v27  ;;  %1409 = vmatprep.subr.bf16.mxu1 %v1510_v50 }
 0x11a   :  { %v764_v33 = vsub.f32 %v762_v23, %v763_v30  ;;  %v1410_v34 = vpack.c.bf16 %v758_v26, %v751_v29  ;;  %v1431_v35 = vpack.c.bf16 %v770_v27, %v763_v30 }
 0x11b   :  { %v772_v36 = vand.u32 4294901760, %v771_v32  ;;  %1322 = vmatmul.mubr.f32.vlgmr.msra.gmra.mrb[0].mxu1 %v740_v28 }
 0x11c   :  { %v765_v37 = vand.u32 4294901760, %v764_v33  ;;  %1411 = vmatpush3.bf16.msra.mxu1 %v1410_v34  ;;  %1332 = vmatprep.mubr.msk.f32.mxu1 %vm1511_vm1, %v1512_v51 }
 0x11d   :  { %1412 = vmatprep.subr.bf16.mxu1 %v1510_v50 }
 0x11e   :  { %v1413_v38 = vpack.c.bf16 %v772_v36, %v765_v37 }
 0x120   :  { %1414 = vmatpush3.bf16.msra.mxu1 %v1413_v38 }
 0x121   :  { %1415 = vmatprep.subr.bf16.mxu1 %v1510_v50 }
 0x123   :  { %1333 = vmatmul.mubr.f32.vlgmr.msra.gmra.mrb[0].mxu1 %v1615_v55 }
 0x124   :  { %1417 = vmatpush3.bf16.msra.mxu1 %v1416_v19  ;;  %1343 = vmatprep.mubr.msk.f32.mxu1 %vm1511_vm1, %v1512_v51 }
 0x125   :  { %1418 = vmatprep.subr.bf16.mxu1 %v1510_v50 }
 0x128   :  { %1420 = vmatpush3.bf16.msra.mxu1 %v1419_v31 }
 0x129   :  { %1421 = vmatprep.subr.bf16.mxu1 %v1510_v50 }
 0x12b   :  { %1344 = vmatmul.mubr.f32.vlgmr.msra.gmra.mrb[0].mxu1 %v1618_v61 }
 0x12c   :  { %1423 = vmatpush3.bf16.msra.mxu1 %v1404_v13  ;;  %1354 = vmatprep.mubr.msk.f32.mxu1 %vm1511_vm1, %v1512_v51 }
 0x12d   :  { %1424 = vmatprep.subr.bf16.mxu1 %v1510_v50 }
 0x130   :  { %1426 = vmatpush3.bf16.msra.mxu1 %v1407_v24 }
 0x131   :  { %1427 = vmatprep.subr.bf16.mxu1 %v1510_v50 }
 0x133   :  { %1355 = vmatmul.mubr.f32.vlgmr.msra.gmra.mrb[0].mxu1 %v738_v6 }
 0x134   :  { %1429 = vmatpush3.bf16.msra.mxu1 %v1428_v25  ;;  %1365 = vmatprep.mubr.msk.f32.mxu1 %vm1511_vm1, %v1512_v51 }
 0x135   :  { %1430 = vmatprep.subr.bf16.mxu1 %v1510_v50 }
 0x138   :  { %1432 = vmatpush3.bf16.msra.mxu1 %v1431_v35 }
 0x139   :  { %1433 = vmatprep.subr.bf16.mxu1 %v1510_v50 }
 0x13b   :  { %1366 = vmatmul.mubr.f32.vlgmr.msra.gmra.mrb[0].mxu1 %v1615_v55 }
 0x13c   :  { %1435 = vmatpush3.bf16.msra.mxu1 %v1404_v13  ;;  %1376 = vmatprep.mubr.msk.f32.mxu1 %vm1511_vm1, %v1512_v51 }
 0x13d   :  { %1436 = vmatprep.subr.bf16.mxu1 %v1510_v50 }
 0x140   :  { %1438 = vmatpush3.bf16.msra.mxu1 %v1407_v24 }
 0x143   :  { %1377 = vmatmul.mubr.f32.vlgmr.msra.gmra.mrb[0].mxu1 %v1615_v55 }
 0x216   :  { %v1148_v40 = vpop.f32.mrb[0].mxu1 }
 0x217   :  { %v1443_v41 = vadd.f32 %v1148_v40, %v661_v39  ;;  %v1378_v42 = vpop.f32.mrb[1].mxu1 }
 0x219   :  { %v1153_v43 = vsel %vm1152_vm3, %v1443_v41, -inf }
 0x21a   :  { %v1154_v44 = vrot.slane %v1153_v43, 4 }
 0x21c   :  { %v1155_v45 = vmax.f32 %v1153_v43, %v1154_v44 }
 0x21e   :  { %v1156_v46 = vrot.slane %v1155_v45, 2 }
 0x220   :  { %v1157_v47 = vmax.f32 %v1155_v45, %v1156_v46 }
 0x222   :  { %v1158_v48 = vrot.slane %v1157_v47, 1 }
 0x224   :  { %v1159_v49 = vmax.f32 %v1157_v47, %v1158_v48 }
 0x226   :  { %v1160_v52 = vsub.f32 %v1443_v41, %v1159_v49 }
 0x228   :  { %v1161_v51 = vmul.f32 1.442695, %v1160_v52 }
 0x22a   :  { %1481 = vpow2.f32 %v1161_v51 }
 0x234   :  { %v1482_v50 = vpop.eup %1481 }
 0x235   :  { %v1163_v53 = vsel %vm1152_vm3, %v1482_v50, 0.0 }
 0x236   :  { %v1164_v54 = vrot.slane %v1163_v53, 4 }
 0x238   :  { %v1165_v55 = vadd.f32 %v1164_v54, %v1163_v53 }
 0x23a   :  { %v1166_v56 = vrot.slane %v1165_v55, 2 }
 0x23c   :  { %v1167_v57 = vadd.f32 %v1166_v56, %v1165_v55 }
 0x23e   :  { %v1168_v58 = vrot.slane %v1167_v57, 1 }
 0x240   :  { %v1169_v59 = vadd.f32 %v1168_v58, %v1167_v57 }
 0x242   :  { %1483 = vrcp.f32 %v1169_v59 }
 0x24c   :  { %v1484_v60 = vpop.eup %1483 }
 0x24d   :  { %v1171_v61 = vmul.f32 %v1484_v60, %v1482_v50 }
 0x24f   :  { %1172 = vst.msk [vmem:[#allocation2] sm:$0xf] %vm1152_vm3, %v1171_v61 }
 0x250   :  { %1496 = shalt.err (!%p1493_p4)
}
 0x251   :  { %s1497_s17 = scalar_lea.hbm %s1667_s5, 64 }
 0x252   :  { %p1498_p5 = scmp.ne.s32.totalorder %s1667_s5, %s1497_s17  ;;  %p1501_p6 = scmp.lt.u32.totalorder %s1497_s17, %s1667_s5 }
 0x254   :  { %p1503_p7 = pnand %p1501_p6, %p1498_p5 }
 0x256   :  { %1506 = shalt.err (!%p1503_p7)
}
 0x257   :  { %1182 = dma.vmem_to_hbm [thread:$0]  %s1180_s13, 64, %s1667_s5, [#allocation3]  }
 0x258   :  { %1507 = dma.done.wait [#allocation3], 64  }
 0x259   :  { %1508 = vsyncadd [#allocation3], 4294967232 }
 0x25a   :  { %1186 = vsyncpa [#allocation3], 1 }

</bundles_post_ra>
